<compile_context>
chip_gen: v7x
topology: tpu7x:2x2x1
jax: 0.10.0
libtpu: 0.0.40
codegen_flags: <defaults>
</compile_context>

<pallas_src>
import jax
import jax.numpy as jnp
from jax.experimental import pallas as pl
from jax.experimental.pallas import tpu as pltpu


def combined_kernel(x_ref,      # [tile_n, C+1, HW]  gathered rows + ones channel
                    w1t_ref,    # [F, C+1]           conv weight^T with bias column
                    w23_ref,    # [F, Hh]            (w2 @ w3) / HW
                    bias_ref,   # [2, max(Hh, D)]    row0 = b23, row1 = b4 (padded)
                    w4_ref,     # [Hh, D]
                    out_ref):   # [tile_n, D]
    tile_n, c1, hw = x_ref.shape
    f = w1t_ref.shape[0]
    hh, d = w4_ref.shape

    x = x_ref[...]                                                   # [tile_n, C+1, HW]

    # 1x1 conv (+ folded bias) as a batched MXU matmul: per row [F,C+1]@[C+1,HW].
    w1b = jnp.broadcast_to(w1t_ref[...][None, :, :], (tile_n, f, c1))
    h = jax.lax.dot_general(
        w1b, x,
        dimension_numbers=(((2,), (1,)), ((0,), (0,))),
        preferred_element_type=jnp.float32)                          # [tile_n, F, HW]
    h = jnp.maximum(h, 0.0)                                          # lane-dense ReLU

    # Global average pool over HW (1/HW scale is folded into w23).
    p = jnp.sum(h, axis=-1)                                          # [tile_n, F]

    # Fused embed-linear + triplet fc1, then ReLU.
    t = jnp.dot(p, w23_ref[...], preferred_element_type=jnp.float32) + bias_ref[0:1, :hh]
    t = jnp.maximum(t, 0.0)                                          # [tile_n, Hh]

    # Triplet fc2.
    o = jnp.dot(t, w4_ref[...], preferred_element_type=jnp.float32) + bias_ref[1:2, :d]

    # L2 normalize: o / max(||o||, 1e-12)  ==  o * rsqrt(max(sumsq, 1e-24)).
    sumsq = jnp.sum(o * o, axis=-1, keepdims=True)
    inv = jax.lax.rsqrt(jnp.maximum(sumsq, 1e-24))
    out_ref[...] = o * inv


def combined_forward(x_nchw, index, params, tile_n=8):
    w1, b1, w2, b2, w3, b3, w4, b4 = params
    B, C, H, W = x_nchw.shape
    HW = H * W
    F_ = w1.shape[1]
    Hh = w3.shape[1]
    D = w4.shape[1]
    N = index.shape[0]

    # Row tiling over the gathered batch.
    if N <= tile_n:
        tile_n = N
    n_pad = pl.cdiv(N, tile_n) * tile_n
    idx = index
    if n_pad != N:
        idx = jnp.concatenate([index, jnp.zeros((n_pad - N,), index.dtype)])

    # Free reshape of NCHW -> [B, C, HW]; gather rows on host (B, N tiny); append a
    # ones channel so the conv bias folds into the conv matmul.
    x_rows = jnp.take(x_nchw.reshape(B, C, HW), idx, axis=0)                 # [n_pad, C, HW]
    x_aug = jnp.concatenate(
        [x_rows, jnp.ones((n_pad, 1, HW), x_rows.dtype)], axis=1)            # [n_pad, C+1, HW]
    C1 = C + 1

    # Trace-time parameter prep (all tiny).
    w1t = jnp.concatenate([w1.T, b1.reshape(F_, 1)], axis=1)                 # [F, C+1]
    w23 = (w2 @ w3) / HW                                                     # [F, Hh]
    b23 = b2 @ w3 + b3                                                       # [1, Hh]
    BW = max(Hh, D)
    bias = jnp.concatenate(
        [jnp.pad(b23, ((0, 0), (0, BW - Hh))),
         jnp.pad(b4, ((0, 0), (0, BW - D)))], axis=0)                        # [2, BW]

    out = pl.pallas_call(
        combined_kernel,
        out_shape=jax.ShapeDtypeStruct((n_pad, D), jnp.float32),
        grid=(n_pad // tile_n,),
        in_specs=[
            pl.BlockSpec((tile_n, C1, HW), lambda i: (i, 0, 0)),
            pl.BlockSpec((F_, C1), lambda i: (0, 0)),
            pl.BlockSpec((F_, Hh), lambda i: (0, 0)),
            pl.BlockSpec((2, BW), lambda i: (0, 0)),
            pl.BlockSpec((Hh, D), lambda i: (0, 0)),
        ],
        out_specs=pl.BlockSpec((tile_n, D), lambda i: (i, 0)),
        compiler_params=pltpu.CompilerParams(
            dimension_semantics=("parallel",)),
    )(x_aug, w1t, w23, bias, w4)
    return out[:N]


def reference_forward(x_nchw, index, params):
    """Pure-JAX reference mirroring the (unfused) PyTorch composition."""
    w1, b1, w2, b2, w3, b3, w4, b4 = params
    B, C, H, W = x_nchw.shape
    x = jnp.transpose(x_nchw, (0, 2, 3, 1)).reshape(B, H * W, C)
    x = x[index]                                                    # gather
    h = jnp.maximum(jnp.einsum('bsc,cf->bsf', x, w1) + b1[None], 0.0)
    p = jnp.mean(h, axis=1)                                         # GAP
    e = p @ w2 + b2
    t = jnp.maximum(e @ w3 + b3, 0.0)
    o = t @ w4 + b4
    n = jnp.sqrt(jnp.sum(o * o, axis=-1, keepdims=True))
    return o / jnp.maximum(n, 1e-12)


def make_params(key, C, F, E, Hh, D):
    ks = jax.random.split(key, 8)
    scale = 0.1
    w1 = scale * jax.random.normal(ks[0], (C, F), jnp.float32)
    b1 = scale * jax.random.normal(ks[1], (1, F), jnp.float32)
    w2 = scale * jax.random.normal(ks[2], (F, E), jnp.float32)
    b2 = scale * jax.random.normal(ks[3], (1, E), jnp.float32)
    w3 = scale * jax.random.normal(ks[4], (E, Hh), jnp.float32)
    b3 = scale * jax.random.normal(ks[5], (1, Hh), jnp.float32)
    w4 = scale * jax.random.normal(ks[6], (Hh, D), jnp.float32)
    b4 = scale * jax.random.normal(ks[7], (1, D), jnp.float32)
    return (w1, b1, w2, b2, w3, b3, w4, b4)


if __name__ == "__main__":
    B, C, H, W = 2, 4, 16, 16
    F_, E, Hh, D = 8, 32, 32, 16

    key = jax.random.PRNGKey(0)
    kx, kp = jax.random.split(key)
    x = jax.random.normal(kx, (B, C, H, W), jnp.float32)
    index = jnp.array([1, 0], dtype=jnp.int32)     # batch-row selection/permutation
    params = make_params(kp, C, F_, E, Hh, D)

    out = combined_forward(x, index, params)
    out = jax.block_until_ready(out)

    ref = reference_forward(x, index, params)
    assert out.shape == (index.shape[0], D)
    assert jnp.allclose(out, ref, atol=1e-5, rtol=1e-5), "mismatch vs JAX reference"

    print("KERNEL_OK")
</pallas_src>

<mosaic_0001>
module attributes {stable_mosaic.version = 11 : i64} {
  func.func @combined_kernel(%arg0: i32, %arg1: memref<2x5x256xf32, #tpu.memory_space<vmem>>, %arg2: memref<8x5xf32, #tpu.memory_space<vmem>>, %arg3: memref<8x32xf32, #tpu.memory_space<vmem>>, %arg4: memref<2x32xf32, #tpu.memory_space<vmem>>, %arg5: memref<32x16xf32, #tpu.memory_space<vmem>>, %arg6: memref<2x16xf32, #tpu.memory_space<vmem>>) attributes {dimension_semantics = [#tpu.dimension_semantics<parallel>], iteration_bounds = array<i64: 1>, scalar_prefetch = 0 : i64, scratch_operands = 0 : i64, tpu.core_type = #tpu.core_type<tc>, window_params = [{transform_indices = @transform_0, window_bounds = array<i64: 2, 5, 256>}, {pipeline_mode = #tpu.pipeline_mode<synchronous>, transform_indices = @transform_1, window_bounds = array<i64: 8, 5>}, {pipeline_mode = #tpu.pipeline_mode<synchronous>, transform_indices = @transform_2, window_bounds = array<i64: 8, 32>}, {pipeline_mode = #tpu.pipeline_mode<synchronous>, transform_indices = @transform_3, window_bounds = array<i64: 2, 32>}, {pipeline_mode = #tpu.pipeline_mode<synchronous>, transform_indices = @transform_4, window_bounds = array<i64: 32, 16>}, {transform_indices = @transform_5, window_bounds = array<i64: 2, 16>}]} {
    %c0 = arith.constant 0 : index
    %c0_0 = arith.constant 0 : index
    %c0_1 = arith.constant 0 : index
    %0 = vector.load %arg1[%c0, %c0_0, %c0_1] : memref<2x5x256xf32, #tpu.memory_space<vmem>>, vector<2x5x256xf32>
    %c0_2 = arith.constant 0 : index
    %c0_3 = arith.constant 0 : index
    %1 = vector.load %arg2[%c0_2, %c0_3] : memref<8x5xf32, #tpu.memory_space<vmem>>, vector<8x5xf32>
    %2 = vector.shape_cast %1 : vector<8x5xf32> to vector<1x8x5xf32>
    %3 = vector.shape_cast %2 : vector<1x8x5xf32> to vector<1x8x5xf32>
    %4 = vector.broadcast %3 : vector<1x8x5xf32> to vector<2x8x5xf32>
    %cst = arith.constant dense<0.000000e+00> : vector<2x8x256xf32>
    %5 = tpu.matmul %4, %0, %cst {dimension_numbers = #tpu.dot_dimension_numbers<[2], [1], [1], [2], [0, 0, 0, 1, 1, 2], [0], [0]>} : vector<2x8x5xf32>, vector<2x5x256xf32>, vector<2x8x256xf32> -> vector<2x8x256xf32>
    %cst_4 = arith.constant 0.000000e+00 : f32
    %6 = vector.broadcast %cst_4 : f32 to vector<2x8x256xf32>
    %7 = arith.maximumf %5, %6 : vector<2x8x256xf32>
    %cst_5 = arith.constant dense<0.000000e+00> : vector<2x8xf32>
    %8 = vector.multi_reduction <add>, %7, %cst_5 [2] : vector<2x8x256xf32> to vector<2x8xf32>
    %c0_6 = arith.constant 0 : index
    %c0_7 = arith.constant 0 : index
    %9 = vector.load %arg3[%c0_6, %c0_7] : memref<8x32xf32, #tpu.memory_space<vmem>>, vector<8x32xf32>
    %cst_8 = arith.constant dense<0.000000e+00> : vector<2x32xf32>
    %10 = tpu.matmul %8, %9, %cst_8 {dimension_numbers = #tpu.dot_dimension_numbers<[1], [0], [0], [1], [0, 0, 1, 1], [], []>} : vector<2x8xf32>, vector<8x32xf32>, vector<2x32xf32> -> vector<2x32xf32>
    %c0_9 = arith.constant 0 : index
    %c0_10 = arith.constant 0 : index
    %11 = vector.load %arg4[%c0_9, %c0_10] : memref<2x32xf32, #tpu.memory_space<vmem>>, vector<1x32xf32>
    %12 = vector.broadcast %11 : vector<1x32xf32> to vector<2x32xf32>
    %13 = arith.addf %10, %12 : vector<2x32xf32>
    %cst_11 = arith.constant 0.000000e+00 : f32
    %14 = vector.broadcast %cst_11 : f32 to vector<2x32xf32>
    %15 = arith.maximumf %13, %14 : vector<2x32xf32>
    %c0_12 = arith.constant 0 : index
    %c0_13 = arith.constant 0 : index
    %16 = vector.load %arg5[%c0_12, %c0_13] : memref<32x16xf32, #tpu.memory_space<vmem>>, vector<32x16xf32>
    %cst_14 = arith.constant dense<0.000000e+00> : vector<2x16xf32>
    %17 = tpu.matmul %15, %16, %cst_14 {dimension_numbers = #tpu.dot_dimension_numbers<[1], [0], [0], [1], [0, 0, 1, 1], [], []>} : vector<2x32xf32>, vector<32x16xf32>, vector<2x16xf32> -> vector<2x16xf32>
    %c1 = arith.constant 1 : index
    %c0_15 = arith.constant 0 : index
    %18 = vector.load %arg4[%c1, %c0_15] : memref<2x32xf32, #tpu.memory_space<vmem>>, vector<1x16xf32>
    %19 = vector.broadcast %18 : vector<1x16xf32> to vector<2x16xf32>
    %20 = arith.addf %17, %19 : vector<2x16xf32>
    %21 = arith.mulf %20, %20 : vector<2x16xf32>
    %cst_16 = arith.constant dense<0.000000e+00> : vector<2xf32>
    %22 = vector.multi_reduction <add>, %21, %cst_16 [1] : vector<2x16xf32> to vector<2xf32>
    %23 = vector.shape_cast %22 : vector<2xf32> to vector<2x1xf32>
    %cst_17 = arith.constant 1.000000e-24 : f32
    %24 = vector.broadcast %cst_17 : f32 to vector<2x1xf32>
    %25 = arith.maximumf %23, %24 : vector<2x1xf32>
    %26 = math.rsqrt %25 : vector<2x1xf32>
    %27 = vector.broadcast %26 : vector<2x1xf32> to vector<2x16xf32>
    %28 = arith.mulf %20, %27 : vector<2x16xf32>
    %c0_18 = arith.constant 0 : index
    %c0_19 = arith.constant 0 : index
    %29 = vector.load %arg6[%c0_18, %c0_19] : memref<2x16xf32, #tpu.memory_space<vmem>>, vector<2x16xf32>
    tpu.vector_store %arg6[%c0_18, %c0_19], %28 {strides = array<i32>} : memref<2x16xf32, #tpu.memory_space<vmem>>, vector<2x16xf32>,
    return
  }
  func.func @transform_0(%arg0: i32) -> (i32, i32, i32) {
    %c0_i32 = arith.constant 0 : i32
    %c0_i32_0 = arith.constant 0 : i32
    %c0_i32_1 = arith.constant 0 : i32
    return %arg0, %c0_i32, %c0_i32_0 : i32, i32, i32
  }
  func.func @transform_1(%arg0: i32) -> (i32, i32) {
    %c0_i32 = arith.constant 0 : i32
    %c0_i32_0 = arith.constant 0 : i32
    %c0_i32_1 = arith.constant 0 : i32
    return %c0_i32, %c0_i32_0 : i32, i32
  }
  func.func @transform_2(%arg0: i32) -> (i32, i32) {
    %c0_i32 = arith.constant 0 : i32
    %c0_i32_0 = arith.constant 0 : i32
    %c0_i32_1 = arith.constant 0 : i32
    return %c0_i32, %c0_i32_0 : i32, i32
  }
  func.func @transform_3(%arg0: i32) -> (i32, i32) {
    %c0_i32 = arith.constant 0 : i32
    %c0_i32_0 = arith.constant 0 : i32
    %c0_i32_1 = arith.constant 0 : i32
    return %c0_i32, %c0_i32_0 : i32, i32
  }
  func.func @transform_4(%arg0: i32) -> (i32, i32) {
    %c0_i32 = arith.constant 0 : i32
    %c0_i32_0 = arith.constant 0 : i32
    %c0_i32_1 = arith.constant 0 : i32
    return %c0_i32, %c0_i32_0 : i32, i32
  }
  func.func @transform_5(%arg0: i32) -> (i32, i32) {
    %c0_i32 = arith.constant 0 : i32
    %c0_i32_0 = arith.constant 0 : i32
    return %arg0, %c0_i32 : i32, i32
  }
}

</mosaic_0001>

<bundles_post_ra>
// kernel: tpu_custom_call.1
= control target key start
LH: loop header
LB: loop body
LE: loop exit
PB: predicated region body
PF: predicated region fallthrough
CT: control target
= control target key end

     0   :  { %vm30_vm0 = vcmask 1044480   ;;  %v464_v2 = vmov 0.0   ;;  %vm26_vm1 = vcmask 39936   ;;  %s546_s0 = inlined_call_operand.vmem [shape: f32[2,5,256], index: 0, kind: input, shape index: {}]   ;;  %s547_s1 = inlined_call_operand.vmem [shape: f32[8,5], index: 1, kind: input, shape index: {}]   ;;  %s548_s2 = inlined_call_operand.vmem [shape: f32[8,32], index: 2, kind: input, shape index: {}]   ;;  %s549_s3 = inlined_call_operand.vmem [shape: f32[2,32], index: 3, kind: input, shape index: {}]   ;;  %s550_s4 = inlined_call_operand.vmem [shape: f32[32,16], index: 4, kind: input, shape index: {}]   ;;  %s551_s5 = inlined_call_operand.hbm [shape: f32[2,16], index: 5, kind: output, shape index: {}]  }
   0x1   :  { %v22_v0 = vld [vmem:[%s546_s0 + $0x8] sm:$0x1f]  ;;  %v21_v1 = vld [vmem:[%s546_s0] sm:$0x1f]  ;;  %101 = vmatprep.mubr.f32.mxu0 %v464_v2  ;;  %v24_v4 = vld [vmem:[%s546_s0 + $0x18] sm:$0x1f] }
   0x2   :  { %395 = vmatprep.subr.msk.mxu0 %vm30_vm0, %v22_v0  ;;  %v25_v3 = vld [vmem:[%s547_s1] sm:$0xff]  ;;  %v23_v5 = vld [vmem:[%s546_s0 + $0x10] sm:$0x1f]  ;;  %398 = vmatprep.subr.msk.mxu1 %vm30_vm0, %v24_v4 }
   0x3   :  { %396 = vmatpush1.msk.msra.mxu0 %vm30_vm0, %v21_v1 }
   0x4   :  { %10 = vsyncpa [#allocation3], 0  ;;  %397 = vmatmul.mubr.msk.f32.vlgmr.msra.gmra.mrb[0].mxu0 %vm26_vm1, %v25_v3  ;;  %399 = vmatpush1.msk.msra.mxu1 %vm30_vm0, %v23_v5  ;;  %v195_v16 = vld [vmem:[%s548_s2] sm:$0xff]  ;;  %vm465_vm2 = vmmov 0   ;;  %v290_v18 = vld [vmem:[%s550_s4 + $0x8] sm:$0xff]  ;;  %v466_v19 = vmov 0.0|0.0   ;;  %v203_v21 = vlaneseq }
   0x5   :  { %178 = vmatprep.mubr.f32.mxu1 %v464_v2  ;;  %412 = vmatprep.subr.mxu0 %v464_v2  ;;  %v289_v17 = vld [vmem:[%s550_s4] sm:$0xff]  ;;  %vm213_vm3 = vcmask 1041409   ;;  %vm215_vm4 = vcmask 64512   ;;  %v291_v30 = vld [vmem:[%s550_s4 + $0x10] sm:$0xff]  ;;  %v292_v31 = vld [vmem:[%s550_s4 + $0x18] sm:$0xff]  ;;  %vm298_vm5 = vcmask 261120  }
   0x6   :  { %400 = vmatmul.mubr.msk.f32.vlgmr.msra.gmra.mrb[0].mxu1 %vm26_vm1, %v25_v3  ;;  %413 = vmatpush3.msra.mxu0 %v195_v16  ;;  %v429_v20 = vpack.c.bf16 %v290_v18, %v289_v17  ;;  %v204_v22 = vand.u32 127, %v203_v21  ;;  %v206_v23 = vshrl.u32 %v203_v21, 7  ;;  %v432_v32 = vpack.c.bf16 %v292_v31, %v291_v30  ;;  %v401_v33 = vld [vmem:[%s549_s3] ss:$0 sm:$0xff]  ;;  %v403_v38 = vld [vmem:[%s549_s3 + $0x1] ss:$0 sm:$0xff] }
   0x7   :  { %414 = vmatprep.mubr.msk.f32.mxu0 %vm465_vm2, %v464_v2  ;;  %425 = vmatprep.mubr.msk.f32.mxu1 %vm465_vm2, %v464_v2  ;;  %vm373_vm6 = vcmask 123904   ;;  %s467_s4 = smov [#allocation2]  }
   0x8   :  { %428 = vmatprep.subr.bf16.mxu1 %v466_v19  ;;  %v207_v25 = vsub.s32 %v204_v22, %v206_v23  ;;  %s387_s14 = sshll.u32 %s467_s4, 4  ;;  %s388_s14 = int_to_ptr.vmem [resolvable:$true] %s387_s14 }
   0x9   :  { %430 = vmatpush3.bf16.msra.mxu1 %v429_v20  ;;  %s440_s15 = scalar_lea.vmem %s388_s14, 32  ;;  %p445_p1 = scmp.lt.s32.totalorder %s388_s14, %s388_s14 }
   0xa   :  { %431 = vmatprep.subr.bf16.mxu1 %v466_v19  ;;  %p441_p0 = scmp.ne.s32.totalorder %s388_s14, %s440_s15  ;;  %p446_p2 = scmp.lt.s32.totalorder %s440_s15, %s440_s15 }
   0xc   :  { %p447_p3 = por %p446_p2, %p445_p1 }
   0xd   :  { %433 = vmatpush3.bf16.msra.mxu1 %v432_v32 }
   0xe   :  { %p448_p4 = pnand %p447_p3, %p441_p0 }
  0xd7   :  { %v103_v6 = vpop.f32.mrb[0].mxu0 }
  0xd8   :  { %v185_v7 = vmax.f32 %v103_v6, 0.0  ;;  %v105_v8 = vpop.f32.mrb[1].mxu0 }
  0xd9   :  { %v186_v9 = vmax.f32 %v105_v8, 0.0  ;;  %v180_v10 = vpop.f32.mrb[0].mxu1 }
  0xda   :  { %v187_v11 = vmax.f32 %v180_v10, 0.0  ;;  %v182_v12 = vpop.f32.mrb[1].mxu1 }
  0xdb   :  { %v188_v13 = vmax.f32 %v182_v12, 0.0  ;;  %v189_v14 = vadd.f32 %v186_v9, %v185_v7 }
  0xdd   :  { %190 = vadd.xlane.f32.xlu0 %v189_v14  ;;  %v192_v15 = vadd.f32 %v188_v13, %v187_v11 }
  0xe1   :  { %193 = vadd.xlane.f32.xlu0 %v192_v15 }
 0x16a   :  { %v191_v24 = vpop.xlane.xlu0 %190 }
 0x16b   :  { %v208_v27 = vrot.slane %v191_v24, %v207_v25 }
 0x16e   :  { %v194_v26 = vpop.xlane.xlu0 %193 }
 0x16f   :  { %v212_v28 = vrot.slane %v194_v26, %v207_v25 }
 0x171   :  { %v214_v29 = vsel %vm213_vm3, %v212_v28, %v208_v27 }
 0x172   :  { %415 = vmatmul.mubr.msk.f32.vlgmr.msra.gmra.mrb[2].mxu0 %vm215_vm4, %v214_v29 }
 0x245   :  { %v284_v34 = vpop.f32.mrb[2].mxu0 }
 0x246   :  { %v285_v35 = vadd.f32 %v401_v33, %v284_v34  ;;  %v416_v36 = vpop.f32.mrb[3].mxu0 }
 0x248   :  { %v288_v37 = vmax.f32 %v285_v35, 0.0 }
 0x24a   :  { %426 = vmatmul.mubr.msk.f32.vlgmr.msra.gmra.mrb[2].mxu1 %vm298_vm5, %v288_v37 }
 0x31d   :  { %v368_v39 = vpop.f32.mrb[2].mxu1 }
 0x31e   :  { %v369_v40 = vadd.f32 %v403_v38, %v368_v39  ;;  %v427_v41 = vpop.f32.mrb[3].mxu1 }
 0x320   :  { %v372_v42 = vmul.f32 %v369_v40, %v369_v40 }
 0x322   :  { %v374_v43 = vsel %vm373_vm6, %v372_v42, 0.0 }
 0x323   :  { %375 = vadd.xlane.f32.xlu1 %v374_v43 }
 0x3b0   :  { %v376_v44 = vpop.xlane.xlu1 %375 }
 0x3b1   :  { %v377_v45 = vmax.f32 %v376_v44, 1e-24 }
 0x3b3   :  { %438 = vrsqrt.f32 %v377_v45 }
 0x3bd   :  { %v439_v46 = vpop.eup %438 }
 0x3be   :  { %v379_v47 = vmul.f32 %v439_v46, %v369_v40 }
 0x3c0   :  { %380 = vst.msk [vmem:[#allocation2] sm:$0x3] %vm373_vm6, %v379_v47 }
 0x3c1   :  { %451 = shalt.err (!%p448_p4)
}
 0x3c2   :  { %s452_s17 = scalar_lea.hbm %s551_s5, 32 }
 0x3c3   :  { %p453_p5 = scmp.ne.s32.totalorder %s551_s5, %s452_s17  ;;  %p456_p6 = scmp.lt.u32.totalorder %s452_s17, %s551_s5 }
 0x3c5   :  { %p458_p7 = pnand %p456_p6, %p453_p5 }
 0x3c7   :  { %461 = shalt.err (!%p458_p7)
}
 0x3c8   :  { %390 = dma.vmem_to_hbm [thread:$0]  %s388_s14, 32, %s551_s5, [#allocation3]  }
 0x3c9   :  { %462 = dma.done.wait [#allocation3], 32  }
 0x3ca   :  { %463 = vsyncadd [#allocation3], 4294967264 }
 0x3cb   :  { %394 = vsyncpa [#allocation3], 1 }

</bundles_post_ra>
